<compile_context>
chip_gen: v5e
topology: v5e:2x2
jax: 0.10.0
libtpu: 0.0.40
codegen_flags: <defaults>
</compile_context>

<pallas_src>
import jax
import jax.numpy as jnp
from jax import lax
from jax.experimental import pallas as pl
from jax.experimental.pallas import tpu as pltpu


def _disc_kernel(x_ref, w1_ref, b1_ref, w2_ref, b2_ref, w3_ref, b3_ref, o_ref):
    # Layer 1: Linear + LeakyReLU(0.2).  x arrives in its native dtype and is
    # cast to the matmul dtype on the VPU (free); MXU accumulates in f32.
    x = x_ref[...].astype(w1_ref.dtype)
    h = jnp.dot(x, w1_ref[...], preferred_element_type=jnp.float32)
    h = h + b1_ref[...]
    h = jnp.maximum(h, 0.2 * h)

    # Layer 2: Linear + LeakyReLU(0.2).
    h = jnp.dot(h.astype(w2_ref.dtype), w2_ref[...],
                preferred_element_type=jnp.float32)
    h = h + b2_ref[...]
    h = jnp.maximum(h, 0.2 * h)

    # Layer 3 computed transposed: z = w3^T @ h^T -> (d_out_p, bt).  The tiny
    # output-feature dim lands on sublanes, the batch on lanes, so the output
    # store is lane-dense while writing ~16x fewer bytes than a 128-lane-padded
    # (bt, 128) f32 layout.
    z = lax.dot_general(
        w3_ref[...], h.astype(w3_ref.dtype),
        dimension_numbers=(((0,), (1,)), ((), ())),
        preferred_element_type=jnp.float32)
    z = z + b3_ref[...]                     # b3 is (d_out_p, 1): broadcasts over lanes

    # Numerically stable sigmoid; exp + approx reciprocal both land on the EUP.
    e = jnp.exp(-jnp.abs(z))                # in (0, 1], never overflows
    inv = pl.reciprocal(1.0 + e, approx=True)
    o_ref[...] = jnp.where(z >= 0, inv, e * inv).astype(o_ref.dtype)


def _round_up(n, m):
    return ((n + m - 1) // m) * m


def _pad_to(a, shape):
    pads = [(0, s - d) for d, s in zip(a.shape, shape)]
    return jnp.pad(a, pads)


def prepare_params(params, *, matmul_dtype=jnp.bfloat16):
    """Pad/cast weights ONCE (hoisted out of the per-call forward).

    Hidden dim is lane-padded to a multiple of 128 (zero padding keeps the math
    exact through LeakyReLU); d_out is padded only to 8 sublanes; b3 is stored
    as a (d_out_p, 1) column for the transposed layer-3 output.
    """
    w1, b1 = params["w1"], params["b1"]
    w2, b2 = params["w2"], params["b2"]
    w3, b3 = params["w3"], params["b3"]

    d_in, hidden = w1.shape
    d_out = w3.shape[1]
    hid_p = _round_up(hidden, 128)
    d_out_p = _round_up(d_out, 8)

    return dict(
        w1=_pad_to(w1, (d_in, hid_p)).astype(matmul_dtype),
        b1=_pad_to(b1.reshape(1, -1), (1, hid_p)).astype(jnp.float32),
        w2=_pad_to(w2, (hid_p, hid_p)).astype(matmul_dtype),
        b2=_pad_to(b2.reshape(1, -1), (1, hid_p)).astype(jnp.float32),
        w3=_pad_to(w3, (hid_p, d_out_p)).astype(matmul_dtype),
        b3=_pad_to(b3.reshape(-1, 1), (d_out_p, 1)).astype(jnp.float32),
        d_in=d_in, hidden=hidden, d_out=d_out,
    )


def _choose_batch_tile(B, batch_tile):
    # Balanced tiles: choose the tile count first, then size tiles evenly,
    # rounded up to a multiple of 128 (keeps the transposed output lane-dense
    # and the x tile sublane-aligned; avoids a mostly-padded last tile).
    n = max(1, -(-B // max(batch_tile, 128)))
    # v7x has 2 TensorCores; make sure a big batch yields >= 2 "parallel"
    # grid steps so both cores get work (no-op for small batches).
    if n == 1 and B >= 512:
        n = 2
    return _round_up(-(-B // n), 128)


def discriminator_forward(x, prepared, *, batch_tile=1024,
                          vmem_limit_bytes=32 * 1024 * 1024):
    """x: [B, D_in] (f32 or bf16, unpadded).  prepared: output of prepare_params."""
    w1, b1 = prepared["w1"], prepared["b1"]
    w2, b2 = prepared["w2"], prepared["b2"]
    w3, b3 = prepared["w3"], prepared["b3"]
    d_in, d_out = prepared["d_in"], prepared["d_out"]

    B = x.shape[0]
    assert x.shape[1] == d_in, "x feature dim must match the params' fan-in"
    hid_p = w1.shape[1]
    d_out_p = w3.shape[1]

    bt = _choose_batch_tile(B, batch_tile)
    B_p = _round_up(B, bt)
    if B_p != B:
        x = jnp.pad(x, ((0, B_p - B), (0, 0)))   # zero rows, sliced off below

    grid = (B_p // bt,)

    in_specs = [
        pl.BlockSpec((bt, d_in),       lambda i: (i, 0)),   # x tile (full-extent d_in)
        pl.BlockSpec((d_in, hid_p),    lambda i: (0, 0)),   # w1
        pl.BlockSpec((1, hid_p),       lambda i: (0, 0)),   # b1
        pl.BlockSpec((hid_p, hid_p),   lambda i: (0, 0)),   # w2
        pl.BlockSpec((1, hid_p),       lambda i: (0, 0)),   # b2
        pl.BlockSpec((hid_p, d_out_p), lambda i: (0, 0)),   # w3
        pl.BlockSpec((d_out_p, 1),     lambda i: (0, 0)),   # b3 (column)
    ]
    # Transposed output: (d_out_p, B_p), each grid step owns a lane-block.
    out_specs = pl.BlockSpec((d_out_p, bt), lambda i: (0, i))

    out = pl.pallas_call(
        _disc_kernel,
        out_shape=jax.ShapeDtypeStruct((d_out_p, B_p), jnp.float32),
        grid=grid,
        in_specs=in_specs,
        out_specs=out_specs,
        compiler_params=pltpu.CompilerParams(
            dimension_semantics=("parallel",),
            vmem_limit_bytes=vmem_limit_bytes),
    )(x, w1, b1, w2, b2, w3, b3)

    # Back to the module's [B, d_out] layout (tiny slice + transpose).
    return out[:d_out, :B].T


def init_params(key, input_size, hidden_size, output_size):
    """Deterministic init mimicking nn.Linear's U(-1/sqrt(fan_in), +1/sqrt(fan_in))."""
    ks = jax.random.split(key, 6)

    def lin(kw, kb, fan_in, fan_out):
        bound = 1.0 / jnp.sqrt(jnp.float32(fan_in))
        w = jax.random.uniform(kw, (fan_in, fan_out), jnp.float32, -bound, bound)
        b = jax.random.uniform(kb, (1, fan_out), jnp.float32, -bound, bound)
        return w, b

    w1, b1 = lin(ks[0], ks[1], input_size, hidden_size)
    w2, b2 = lin(ks[2], ks[3], hidden_size, hidden_size)
    w3, b3 = lin(ks[4], ks[5], hidden_size, output_size)
    return dict(w1=w1, b1=b1, w2=w2, b2=b2, w3=w3, b3=b3)


def _reference(x, p):
    def lrelu(v):
        return jnp.where(v > 0, v, 0.2 * v)
    h = lrelu(x @ p["w1"] + p["b1"])
    h = lrelu(h @ p["w2"] + p["b2"])
    return jax.nn.sigmoid(h @ p["w3"] + p["b3"])


if __name__ == "__main__":
    # Small shapes consistent with the module (MLP discriminator).
    batch = 16
    input_size = 64
    hidden_size = 32
    output_size = 1

    key = jax.random.PRNGKey(0)
    k_x, k_p = jax.random.split(key)
    x = jax.random.normal(k_x, (batch, input_size), jnp.float32)
    params = init_params(k_p, input_size, hidden_size, output_size)

    ref = _reference(x, params)

    # Full-precision path: tight tolerance (approx reciprocal ~1e-4 rel err).
    prep_f32 = prepare_params(params, matmul_dtype=jnp.float32)
    out_f32 = jax.block_until_ready(discriminator_forward(x, prep_f32))
    assert out_f32.shape == (batch, output_size)
    assert jnp.allclose(out_f32, ref, atol=2e-3, rtol=2e-3), "f32 mismatch vs reference"

    # Default bf16-matmul path (perf config for v6e/v7x): looser tolerance.
    prep_bf16 = prepare_params(params)
    out_bf16 = jax.block_until_ready(discriminator_forward(x, prep_bf16))
    assert out_bf16.shape == (batch, output_size)
    assert jnp.allclose(out_bf16, ref, atol=2e-2, rtol=2e-2), "bf16 mismatch vs reference"

    print("KERNEL_OK")
</pallas_src>

<mosaic_0001>
module attributes {stable_mosaic.version = 11 : i64} {
  func.func @_disc_kernel(%arg0: i32, %arg1: memref<128x64xf32, #tpu.memory_space<vmem>>, %arg2: memref<64x128xf32, #tpu.memory_space<vmem>>, %arg3: memref<1x128xf32, #tpu.memory_space<vmem>>, %arg4: memref<128x128xf32, #tpu.memory_space<vmem>>, %arg5: memref<1x128xf32, #tpu.memory_space<vmem>>, %arg6: memref<128x8xf32, #tpu.memory_space<vmem>>, %arg7: memref<8x1xf32, #tpu.memory_space<vmem>>, %arg8: memref<8x128xf32, #tpu.memory_space<vmem>>) attributes {dimension_semantics = [#tpu.dimension_semantics<parallel>], iteration_bounds = array<i64: 1>, scalar_prefetch = 0 : i64, scratch_operands = 0 : i64, tpu.core_type = #tpu.core_type<tc>, window_params = [{transform_indices = @transform_0, window_bounds = array<i64: 128, 64>}, {pipeline_mode = #tpu.pipeline_mode<synchronous>, transform_indices = @transform_1, window_bounds = array<i64: 64, 128>}, {pipeline_mode = #tpu.pipeline_mode<synchronous>, transform_indices = @transform_2, window_bounds = array<i64: 1, 128>}, {pipeline_mode = #tpu.pipeline_mode<synchronous>, transform_indices = @transform_3, window_bounds = array<i64: 128, 128>}, {pipeline_mode = #tpu.pipeline_mode<synchronous>, transform_indices = @transform_4, window_bounds = array<i64: 1, 128>}, {pipeline_mode = #tpu.pipeline_mode<synchronous>, transform_indices = @transform_5, window_bounds = array<i64: 128, 8>}, {pipeline_mode = #tpu.pipeline_mode<synchronous>, transform_indices = @transform_6, window_bounds = array<i64: 8, 1>}, {transform_indices = @transform_7, window_bounds = array<i64: 8, 128>}]} {
    %c0 = arith.constant 0 : index
    %c0_0 = arith.constant 0 : index
    %0 = vector.load %arg1[%c0, %c0_0] : memref<128x64xf32, #tpu.memory_space<vmem>>, vector<128x64xf32>
    %c0_1 = arith.constant 0 : index
    %c0_2 = arith.constant 0 : index
    %1 = vector.load %arg2[%c0_1, %c0_2] : memref<64x128xf32, #tpu.memory_space<vmem>>, vector<64x128xf32>
    %cst = arith.constant dense<0.000000e+00> : vector<128x128xf32>
    %2 = tpu.matmul %0, %1, %cst {dimension_numbers = #tpu.dot_dimension_numbers<[1], [0], [0], [1], [0, 0, 1, 1], [], []>} : vector<128x64xf32>, vector<64x128xf32>, vector<128x128xf32> -> vector<128x128xf32>
    %c0_3 = arith.constant 0 : index
    %c0_4 = arith.constant 0 : index
    %3 = vector.load %arg3[%c0_3, %c0_4] : memref<1x128xf32, #tpu.memory_space<vmem>>, vector<1x128xf32>
    %4 = vector.broadcast %3 : vector<1x128xf32> to vector<128x128xf32>
    %5 = arith.addf %2, %4 : vector<128x128xf32>
    %cst_5 = arith.constant 2.000000e-01 : f32
    %6 = vector.broadcast %cst_5 : f32 to vector<128x128xf32>
    %7 = arith.mulf %6, %5 : vector<128x128xf32>
    %8 = arith.maximumf %5, %7 : vector<128x128xf32>
    %c0_6 = arith.constant 0 : index
    %c0_7 = arith.constant 0 : index
    %9 = vector.load %arg4[%c0_6, %c0_7] : memref<128x128xf32, #tpu.memory_space<vmem>>, vector<128x128xf32>
    %cst_8 = arith.constant dense<0.000000e+00> : vector<128x128xf32>
    %10 = tpu.matmul %8, %9, %cst_8 {dimension_numbers = #tpu.dot_dimension_numbers<[1], [0], [0], [1], [0, 0, 1, 1], [], []>} : vector<128x128xf32>, vector<128x128xf32>, vector<128x128xf32> -> vector<128x128xf32>
    %c0_9 = arith.constant 0 : index
    %c0_10 = arith.constant 0 : index
    %11 = vector.load %arg5[%c0_9, %c0_10] : memref<1x128xf32, #tpu.memory_space<vmem>>, vector<1x128xf32>
    %12 = vector.broadcast %11 : vector<1x128xf32> to vector<128x128xf32>
    %13 = arith.addf %10, %12 : vector<128x128xf32>
    %cst_11 = arith.constant 2.000000e-01 : f32
    %14 = vector.broadcast %cst_11 : f32 to vector<128x128xf32>
    %15 = arith.mulf %14, %13 : vector<128x128xf32>
    %16 = arith.maximumf %13, %15 : vector<128x128xf32>
    %c0_12 = arith.constant 0 : index
    %c0_13 = arith.constant 0 : index
    %17 = vector.load %arg6[%c0_12, %c0_13] : memref<128x8xf32, #tpu.memory_space<vmem>>, vector<128x8xf32>
    %cst_14 = arith.constant dense<0.000000e+00> : vector<8x128xf32>
    %18 = tpu.matmul %17, %16, %cst_14 {dimension_numbers = #tpu.dot_dimension_numbers<[0], [1], [1], [0], [0, 1, 1, 0], [], []>} : vector<128x8xf32>, vector<128x128xf32>, vector<8x128xf32> -> vector<8x128xf32>
    %c0_15 = arith.constant 0 : index
    %c0_16 = arith.constant 0 : index
    %19 = vector.load %arg7[%c0_15, %c0_16] : memref<8x1xf32, #tpu.memory_space<vmem>>, vector<8x1xf32>
    %20 = vector.broadcast %19 : vector<8x1xf32> to vector<8x128xf32>
    %21 = arith.addf %18, %20 : vector<8x128xf32>
    %22 = math.absf %21 : vector<8x128xf32>
    %cst_17 = arith.constant 0.000000e+00 : f32
    %23 = vector.broadcast %cst_17 : f32 to vector<8x128xf32>
    %24 = arith.subf %23, %22 : vector<8x128xf32>
    %25 = math.exp %24 : vector<8x128xf32>
    %cst_18 = arith.constant 1.000000e+00 : f32
    %26 = vector.broadcast %cst_18 : f32 to vector<8x128xf32>
    %27 = arith.addf %26, %25 : vector<8x128xf32>
    %28 = tpu.reciprocal %27 {approx = true} : vector<8x128xf32> -> vector<8x128xf32>
    %cst_19 = arith.constant 0.000000e+00 : f32
    %29 = vector.broadcast %cst_19 : f32 to vector<8x128xf32>
    %30 = arith.cmpf oge, %21, %29 : vector<8x128xf32>
    %31 = arith.mulf %25, %28 : vector<8x128xf32>
    %32 = arith.select %30, %28, %31 : vector<8x128xi1>, vector<8x128xf32>
    %c0_20 = arith.constant 0 : index
    %c0_21 = arith.constant 0 : index
    %33 = vector.load %arg8[%c0_20, %c0_21] : memref<8x128xf32, #tpu.memory_space<vmem>>, vector<8x128xf32>
    tpu.vector_store %arg8[%c0_20, %c0_21], %32 {strides = array<i32>} : memref<8x128xf32, #tpu.memory_space<vmem>>, vector<8x128xf32>,
    return
  }
  func.func @transform_0(%arg0: i32) -> (i32, i32) {
    %c0_i32 = arith.constant 0 : i32
    %c0_i32_0 = arith.constant 0 : i32
    return %arg0, %c0_i32 : i32, i32
  }
  func.func @transform_1(%arg0: i32) -> (i32, i32) {
    %c0_i32 = arith.constant 0 : i32
    %c0_i32_0 = arith.constant 0 : i32
    %c0_i32_1 = arith.constant 0 : i32
    return %c0_i32, %c0_i32_0 : i32, i32
  }
  func.func @transform_2(%arg0: i32) -> (i32, i32) {
    %c0_i32 = arith.constant 0 : i32
    %c0_i32_0 = arith.constant 0 : i32
    %c0_i32_1 = arith.constant 0 : i32
    return %c0_i32, %c0_i32_0 : i32, i32
  }
  func.func @transform_3(%arg0: i32) -> (i32, i32) {
    %c0_i32 = arith.constant 0 : i32
    %c0_i32_0 = arith.constant 0 : i32
    %c0_i32_1 = arith.constant 0 : i32
    return %c0_i32, %c0_i32_0 : i32, i32
  }
  func.func @transform_4(%arg0: i32) -> (i32, i32) {
    %c0_i32 = arith.constant 0 : i32
    %c0_i32_0 = arith.constant 0 : i32
    %c0_i32_1 = arith.constant 0 : i32
    return %c0_i32, %c0_i32_0 : i32, i32
  }
  func.func @transform_5(%arg0: i32) -> (i32, i32) {
    %c0_i32 = arith.constant 0 : i32
    %c0_i32_0 = arith.constant 0 : i32
    %c0_i32_1 = arith.constant 0 : i32
    return %c0_i32, %c0_i32_0 : i32, i32
  }
  func.func @transform_6(%arg0: i32) -> (i32, i32) {
    %c0_i32 = arith.constant 0 : i32
    %c0_i32_0 = arith.constant 0 : i32
    %c0_i32_1 = arith.constant 0 : i32
    return %c0_i32, %c0_i32_0 : i32, i32
  }
  func.func @transform_7(%arg0: i32) -> (i32, i32) {
    %c0_i32 = arith.constant 0 : i32
    %c0_i32_0 = arith.constant 0 : i32
    return %c0_i32, %arg0 : i32, i32
  }
}

</mosaic_0001>

<bundles_post_ra>
// kernel: tpu_custom_call.1
= control target key start
LH: loop header
LB: loop body
LE: loop exit
PB: predicated region body
PF: predicated region fallthrough
CT: control target
= control target key end

     0   :  { %s775_s0 = inlined_call_operand.vmem [shape: f32[128,64], index: 0, kind: input, shape index: {}]   ;;  %s776_s1 = inlined_call_operand.vmem [shape: f32[64,128], index: 1, kind: input, shape index: {}]   ;;  %s777_s2 = inlined_call_operand.vmem [shape: f32[1,128], index: 2, kind: input, shape index: {}]   ;;  %s778_s3 = inlined_call_operand.vmem [shape: f32[128,128], index: 3, kind: input, shape index: {}]   ;;  %s779_s4 = inlined_call_operand.vmem [shape: f32[1,128], index: 4, kind: input, shape index: {}]   ;;  %s780_s5 = inlined_call_operand.vmem [shape: f32[128,8], index: 5, kind: input, shape index: {}]   ;;  %s781_s6 = inlined_call_operand.vmem [shape: f32[8,1], index: 6, kind: input, shape index: {}]   ;;  %s782_s7 = inlined_call_operand.hbm [shape: f32[8,128], index: 7, kind: output, shape index: {}]  }
   0x1   :  { %v50_v0 = vld [vmem:[%s776_s1 + $0x38] sm:$0xff]  ;;  %v49_v1 = vld [vmem:[%s776_s1 + $0x30] sm:$0xff]  ;;  %v48_v2 = vld [vmem:[%s776_s1 + $0x28] sm:$0xff] }
   0x2   :  { %112 = vmatpush.msra.mxu0 %v50_v0  ;;  %v47_v3 = vld [vmem:[%s776_s1 + $0x20] sm:$0xff] }
   0x4   :  { %113 = vmatpush.msra.mxu0 %v49_v1 }
   0x5   :  { %12 = vsyncpa [#allocation3], 0  ;;  %v46_v4 = vld [vmem:[%s776_s1 + $0x18] sm:$0xff]  ;;  %v45_v5 = vld [vmem:[%s776_s1 + $0x10] sm:$0xff]  ;;  %vm55_vm0 = vcmask 523264   ;;  %s409_s18 = sshll.u32 %s782_s7, 4  ;;  %s410_s18 = int_to_ptr.hbm [resolvable:$true] %s409_s18 }
   0x6   :  { %114 = vmatpush.msra.mxu0 %v48_v2  ;;  %v44_v6 = vld [vmem:[%s776_s1 + $0x8] sm:$0xff]  ;;  %v43_v7 = vld [vmem:[%s776_s1] sm:$0xff]  ;;  %v29_v10 = vld [vmem:[%s775_s0 + $0x10] sm:$0xff] }
   0x7   :  { %v27_v8 = vld [vmem:[%s775_s0] sm:$0xff]  ;;  %v28_v9 = vld [vmem:[%s775_s0 + $0x8] sm:$0xff]  ;;  %v30_v11 = vld [vmem:[%s775_s0 + $0x18] sm:$0xff] }
   0x8   :  { %115 = vmatpush.msra.mxu0 %v47_v3  ;;  %v31_v12 = vld [vmem:[%s775_s0 + $0x20] sm:$0xff]  ;;  %v32_v13 = vld [vmem:[%s775_s0 + $0x28] sm:$0xff]  ;;  %v33_v14 = vld [vmem:[%s775_s0 + $0x30] sm:$0xff] }
   0x9   :  { %v34_v15 = vld [vmem:[%s775_s0 + $0x38] sm:$0xff]  ;;  %v35_v16 = vld [vmem:[%s775_s0 + $0x40] sm:$0xff]  ;;  %v215_v18 = vld [vmem:[%s778_s3 + $0x70] sm:$0xff] }
   0xa   :  { %116 = vmatpush.msra.mxu0 %v46_v4  ;;  %v216_v17 = vld [vmem:[%s778_s3 + $0x78] sm:$0xff]  ;;  %v36_v19 = vld [vmem:[%s775_s0 + $0x48] sm:$0xff]  ;;  %v213_v21 = vld [vmem:[%s778_s3 + $0x60] sm:$0xff] }
   0xb   :  { %221 = vmatpush.msra.mxu1 %v216_v17  ;;  %434 = vmatpush.msra.mxu3 %v216_v17  ;;  %v214_v20 = vld [vmem:[%s778_s3 + $0x68] sm:$0xff]  ;;  %v212_v22 = vld [vmem:[%s778_s3 + $0x58] sm:$0xff]  ;;  %v211_v23 = vld [vmem:[%s778_s3 + $0x50] sm:$0xff] }
   0xc   :  { %117 = vmatpush.msra.mxu0 %v45_v5  ;;  %v37_v24 = vld [vmem:[%s775_s0 + $0x50] sm:$0xff]  ;;  %v210_v25 = vld [vmem:[%s778_s3 + $0x48] sm:$0xff]  ;;  %v209_v26 = vld [vmem:[%s778_s3 + $0x40] sm:$0xff] }
   0xd   :  { %222 = vmatpush.msra.mxu1 %v215_v18  ;;  %435 = vmatpush.msra.mxu3 %v215_v18  ;;  %v208_v27 = vld [vmem:[%s778_s3 + $0x38] sm:$0xff]  ;;  %v207_v28 = vld [vmem:[%s778_s3 + $0x30] sm:$0xff]  ;;  %v206_v30 = vld [vmem:[%s778_s3 + $0x28] sm:$0xff] }
   0xe   :  { %118 = vmatpush.msra.mxu0 %v44_v6  ;;  %v38_v29 = vld [vmem:[%s775_s0 + $0x58] sm:$0xff]  ;;  %v205_v31 = vld [vmem:[%s778_s3 + $0x20] sm:$0xff]  ;;  %v203_v34 = vld [vmem:[%s778_s3 + $0x10] sm:$0xff] }
   0xf   :  { %223 = vmatpush.msra.mxu1 %v214_v20  ;;  %436 = vmatpush.msra.mxu3 %v214_v20  ;;  %v204_v32 = vld [vmem:[%s778_s3 + $0x18] sm:$0xff]  ;;  %v39_v33 = vld [vmem:[%s775_s0 + $0x60] sm:$0xff]  ;;  %v202_v35 = vld [vmem:[%s778_s3 + $0x8] sm:$0xff] }
  0x10   :  { %119 = vmatpush.msra.mxu0 %v43_v7  ;;  %v201_v36 = vld [vmem:[%s778_s3] sm:$0xff]  ;;  %v40_v37 = vld [vmem:[%s775_s0 + $0x68] sm:$0xff]  ;;  %v41_v38 = vld [vmem:[%s775_s0 + $0x70] sm:$0xff] }
  0x11   :  { %418 = vmatmul.msk.f32.vlgmr.msra.gmra.mxu0 %vm55_vm0, %v27_v8  ;;  %224 = vmatpush.msra.mxu1 %v213_v21  ;;  %v42_v39 = vld [vmem:[%s775_s0 + $0x78] sm:$0xff]  ;;  %v670_v40 = vld [vmem:[%s777_s2] ss:$0 sm:$0xff] }
  0x12   :  { %437 = vmatpush.msra.mxu3 %v213_v21 }
  0x13   :  { %225 = vmatpush.msra.mxu1 %v212_v22 }
  0x14   :  { %438 = vmatpush.msra.mxu3 %v212_v22 }
  0x15   :  { %226 = vmatpush.msra.mxu1 %v211_v23 }
  0x16   :  { %439 = vmatpush.msra.mxu3 %v211_v23 }
  0x17   :  { %227 = vmatpush.msra.mxu1 %v210_v25 }
  0x18   :  { %440 = vmatpush.msra.mxu3 %v210_v25 }
  0x19   :  { %419 = vmatmul.msk.f32.gmra.mxu0 %vm55_vm0, %v28_v9  ;;  %228 = vmatpush.msra.mxu1 %v209_v26 }
  0x1a   :  { %441 = vmatpush.msra.mxu3 %v209_v26 }
  0x1b   :  { %229 = vmatpush.msra.mxu1 %v208_v27 }
  0x1c   :  { %442 = vmatpush.msra.mxu3 %v208_v27 }
  0x1d   :  { %230 = vmatpush.msra.mxu1 %v207_v28 }
  0x1e   :  { %443 = vmatpush.msra.mxu3 %v207_v28 }
  0x1f   :  { %231 = vmatpush.msra.mxu1 %v206_v30 }
  0x20   :  { %444 = vmatpush.msra.mxu3 %v206_v30 }
  0x21   :  { %420 = vmatmul.msk.f32.gmra.mxu0 %vm55_vm0, %v29_v10  ;;  %232 = vmatpush.msra.mxu1 %v205_v31 }
  0x22   :  { %445 = vmatpush.msra.mxu3 %v205_v31 }
  0x23   :  { %233 = vmatpush.msra.mxu1 %v204_v32 }
  0x24   :  { %446 = vmatpush.msra.mxu3 %v204_v32 }
  0x25   :  { %234 = vmatpush.msra.mxu1 %v203_v34 }
  0x26   :  { %447 = vmatpush.msra.mxu3 %v203_v34 }
  0x27   :  { %235 = vmatpush.msra.mxu1 %v202_v35 }
  0x28   :  { %448 = vmatpush.msra.mxu3 %v202_v35 }
  0x29   :  { %421 = vmatmul.msk.f32.gmra.mxu0 %vm55_vm0, %v30_v11  ;;  %236 = vmatpush.msra.mxu1 %v201_v36 }
  0x2a   :  { %449 = vmatpush.msra.mxu3 %v201_v36 }
  0x31   :  { %422 = vmatmul.msk.f32.gmra.mxu0 %vm55_vm0, %v31_v12 }
  0x39   :  { %423 = vmatmul.msk.f32.gmra.mxu0 %vm55_vm0, %v32_v13 }
  0x41   :  { %424 = vmatmul.msk.f32.gmra.mxu0 %vm55_vm0, %v33_v14 }
  0x49   :  { %425 = vmatmul.msk.f32.gmra.mxu0 %vm55_vm0, %v34_v15 }
  0x51   :  { %426 = vmatmul.msk.f32.gmra.mxu0 %vm55_vm0, %v35_v16 }
  0x59   :  { %427 = vmatmul.msk.f32.gmra.mxu0 %vm55_vm0, %v36_v19 }
  0x61   :  { %428 = vmatmul.msk.f32.gmra.mxu0 %vm55_vm0, %v37_v24 }
  0x69   :  { %429 = vmatmul.msk.f32.gmra.mxu0 %vm55_vm0, %v38_v29 }
  0x71   :  { %430 = vmatmul.msk.f32.gmra.mxu0 %vm55_vm0, %v39_v33 }
  0x79   :  { %431 = vmatmul.msk.f32.gmra.mxu0 %vm55_vm0, %v40_v37 }
  0x81   :  { %432 = vmatmul.msk.f32.gmra.mxu0 %vm55_vm0, %v41_v38 }
  0x89   :  { %433 = vmatmul.msk.f32.gmra.mxu0 %vm55_vm0, %v42_v39 }
  0x8e   :  { %v121_v41 = vpop.f32.mrf.mxu0 }
  0x8f   :  { %v122_v42 = vadd.f32 %v670_v40, %v121_v41 }
  0x91   :  { %v169_v43 = vmul.f32 0.2, %v122_v42 }
  0x93   :  { %v185_v44 = vmax.f32 %v122_v42, %v169_v43  ;;  %v318_v42 = vld [vmem:[%s780_s5] sm:$0xff]  ;;  %v319_v43 = vld [vmem:[%s780_s5 + $0x8] sm:$0xff] }
  0x94   :  { %340 = vxpose.xlu0.b32.start [1/16] (narrow) %v318_v42, 8  ;;  %v489_v42 = vmov 0  }
  0x95   :  { %237 = vmatmul.f32.vlgmr.msra.gmra.mxu1 %v185_v44  ;;  %v320_v44 = vld [vmem:[%s780_s5 + $0x10] sm:$0xff]  ;;  %455 = vset.pattern.permute.xlu1 %v489_v42 }
  0x96   :  { %v124_v45 = vpop.f32.mrf.mxu0 }
  0x97   :  { %v125_v46 = vadd.f32 %v670_v40, %v124_v45  ;;  %v322_v45 = vld [vmem:[%s780_s5 + $0x20] sm:$0xff] }
  0x99   :  { %v170_v47 = vmul.f32 0.2, %v125_v46 }
  0x9b   :  { %v186_v48 = vmax.f32 %v125_v46, %v170_v47  ;;  %v323_v46 = vld [vmem:[%s780_s5 + $0x28] sm:$0xff]  ;;  %v324_v47 = vld [vmem:[%s780_s5 + $0x30] sm:$0xff] }
  0x9c   :  { %341 = vxpose.xlu0.b32.cont [2/16] (narrow) %v319_v43, 8 }
  0x9d   :  { %240 = vmatmul.f32.gmra.mxu1 %v186_v48  ;;  %v325_v48 = vld [vmem:[%s780_s5 + $0x38] sm:$0xff] }
  0x9e   :  { %v127_v49 = vpop.f32.mrf.mxu0 }
  0x9f   :  { %v128_v50 = vadd.f32 %v670_v40, %v127_v49  ;;  %v326_v49 = vld [vmem:[%s780_s5 + $0x40] sm:$0xff] }
  0xa1   :  { %v171_v51 = vmul.f32 0.2, %v128_v50 }
  0xa3   :  { %v187_v52 = vmax.f32 %v128_v50, %v171_v51  ;;  %v327_v51 = vld [vmem:[%s780_s5 + $0x48] sm:$0xff] }
  0xa4   :  { %342 = vxpose.xlu0.b32.cont [3/16] (narrow) %v320_v44, 8 }
  0xa5   :  { %243 = vmatmul.f32.gmra.mxu1 %v187_v52 }
  0xa6   :  { %v130_v53 = vpop.f32.mrf.mxu0 }
  0xa7   :  { %v131_v54 = vadd.f32 %v670_v40, %v130_v53 }
  0xa9   :  { %v172_v55 = vmul.f32 0.2, %v131_v54 }
  0xab   :  { %v188_v56 = vmax.f32 %v131_v54, %v172_v55  ;;  %v328_v54 = vld [vmem:[%s780_s5 + $0x50] sm:$0xff] }
  0xad   :  { %246 = vmatmul.f32.gmra.mxu1 %v188_v56  ;;  %v329_v56 = vld [vmem:[%s780_s5 + $0x58] sm:$0xff] }
  0xae   :  { %v133_v57 = vpop.f32.mrf.mxu0 }
  0xaf   :  { %v134_v58 = vadd.f32 %v670_v40, %v133_v57 }
  0xb1   :  { %v173_v59 = vmul.f32 0.2, %v134_v58 }
  0xb3   :  { %v189_v60 = vmax.f32 %v134_v58, %v173_v59  ;;  %v330_v59 = vld [vmem:[%s780_s5 + $0x60] sm:$0xff] }
  0xb5   :  { %249 = vmatmul.f32.gmra.mxu1 %v189_v60 }
  0xb6   :  { %v136_v61 = vpop.f32.mrf.mxu0 }
  0xb7   :  { %v137_v62 = vadd.f32 %v670_v40, %v136_v61  ;;  %v331_v61 = vld [vmem:[%s780_s5 + $0x68] sm:$0xff] }
  0xb9   :  { %v174_v63 = vmul.f32 0.2, %v137_v62 }
  0xbb   :  { %v190_v0 = vmax.f32 %v137_v62, %v174_v63 }
  0xbd   :  { %252 = vmatmul.f32.gmra.mxu1 %v190_v0  ;;  %v332_v0 = vld [vmem:[%s780_s5 + $0x70] sm:$0xff] }
  0xbe   :  { %v139_v1 = vpop.f32.mrf.mxu0 }
  0xbf   :  { %v140_v2 = vadd.f32 %v670_v40, %v139_v1 }
  0xc1   :  { %v175_v3 = vmul.f32 0.2, %v140_v2 }
  0xc3   :  { %v191_v4 = vmax.f32 %v140_v2, %v175_v3  ;;  %v333_v2 = vld [vmem:[%s780_s5 + $0x78] sm:$0xff] }
  0xc5   :  { %255 = vmatmul.f32.gmra.mxu1 %v191_v4 }
  0xc6   :  { %v142_v5 = vpop.f32.mrf.mxu0 }
  0xc7   :  { %v143_v6 = vadd.f32 %v670_v40, %v142_v5  ;;  %v747_v5 = vld [vmem:[%s779_s4] ss:$0 sm:$0xff] }
  0xc9   :  { %v176_v7 = vmul.f32 0.2, %v143_v6 }
  0xcb   :  { %v192_v8 = vmax.f32 %v143_v6, %v176_v7 }
  0xcd   :  { %258 = vmatmul.f32.gmra.mxu1 %v192_v8 }
  0xce   :  { %v145_v9 = vpop.f32.mrf.mxu0 }
  0xcf   :  { %v146_v10 = vadd.f32 %v670_v40, %v145_v9 }
  0xd1   :  { %v177_v11 = vmul.f32 0.2, %v146_v10 }
  0xd3   :  { %v193_v12 = vmax.f32 %v146_v10, %v177_v11 }
  0xd5   :  { %261 = vmatmul.f32.gmra.mxu1 %v193_v12 }
  0xd6   :  { %v148_v13 = vpop.f32.mrf.mxu0 }
  0xd7   :  { %v149_v14 = vadd.f32 %v670_v40, %v148_v13 }
  0xd9   :  { %v178_v15 = vmul.f32 0.2, %v149_v14 }
  0xdb   :  { %v194_v16 = vmax.f32 %v149_v14, %v178_v15 }
  0xdd   :  { %264 = vmatmul.f32.vlgmr.msra.gmra.mxu3 %v194_v16 }
  0xde   :  { %v151_v17 = vpop.f32.mrf.mxu0 }
  0xdf   :  { %v152_v18 = vadd.f32 %v670_v40, %v151_v17 }
  0xe1   :  { %v179_v19 = vmul.f32 0.2, %v152_v18 }
  0xe3   :  { %v195_v20 = vmax.f32 %v152_v18, %v179_v19 }
  0xe5   :  { %267 = vmatmul.f32.gmra.mxu3 %v195_v20 }
  0xe6   :  { %v154_v21 = vpop.f32.mrf.mxu0 }
  0xe7   :  { %v155_v22 = vadd.f32 %v670_v40, %v154_v21 }
  0xe9   :  { %v180_v23 = vmul.f32 0.2, %v155_v22 }
  0xeb   :  { %v196_v24 = vmax.f32 %v155_v22, %v180_v23 }
  0xed   :  { %270 = vmatmul.f32.gmra.mxu3 %v196_v24 }
  0xee   :  { %v157_v25 = vpop.f32.mrf.mxu0 }
  0xef   :  { %v158_v26 = vadd.f32 %v670_v40, %v157_v25 }
  0xf1   :  { %v181_v27 = vmul.f32 0.2, %v158_v26 }
  0xf3   :  { %v197_v28 = vmax.f32 %v158_v26, %v181_v27 }
  0xf5   :  { %273 = vmatmul.f32.gmra.mxu3 %v197_v28 }
  0xf6   :  { %v160_v29 = vpop.f32.mrf.mxu0 }
  0xf7   :  { %v161_v30 = vadd.f32 %v670_v40, %v160_v29 }
  0xf9   :  { %v182_v31 = vmul.f32 0.2, %v161_v30 }
  0xfb   :  { %v198_v32 = vmax.f32 %v161_v30, %v182_v31 }
  0xfd   :  { %276 = vmatmul.f32.gmra.mxu3 %v198_v32 }
  0xfe   :  { %v163_v33 = vpop.f32.mrf.mxu0 }
  0xff   :  { %v164_v34 = vadd.f32 %v670_v40, %v163_v33 }
 0x101   :  { %v183_v35 = vmul.f32 0.2, %v164_v34 }
 0x103   :  { %v199_v36 = vmax.f32 %v164_v34, %v183_v35 }
 0x105   :  { %279 = vmatmul.f32.gmra.mxu3 %v199_v36 }
 0x106   :  { %v166_v37 = vpop.f32.mrf.mxu0 }
 0x107   :  { %v167_v38 = vadd.f32 %v670_v40, %v166_v37  ;;  %v321_v40 = vld [vmem:[%s780_s5 + $0x18] sm:$0xff] }
 0x108   :  { %343 = vxpose.xlu0.b32.cont [4/16] (narrow) %v321_v40, 8 }
 0x109   :  { %v184_v39 = vmul.f32 0.2, %v167_v38 }
 0x10b   :  { %v200_v41 = vmax.f32 %v167_v38, %v184_v39 }
 0x10d   :  { %282 = vmatmul.f32.gmra.mxu3 %v200_v41  ;;  %v334_v41 = vld [vmem:[%s781_s6] sm:$0xff]  ;;  %s490_s6 = smov [#allocation2]  }
 0x10e   :  { %337 = vperm.xlu1 %455, %v334_v41   ;;  %s407_s15 = sshll.u32 %s490_s6, 4  ;;  %s408_s15 = int_to_ptr.vmem [resolvable:$true] %s407_s15 }
 0x110   :  { %344 = vxpose.xlu0.b32.cont [5/16] (narrow) %v322_v45, 8 }
 0x112   :  { %v715_v50 = vpop.f32.mrf.mxu1 }
 0x118   :  { %345 = vxpose.xlu0.b32.cont [6/16] (narrow) %v323_v46, 8 }
 0x11a   :  { %v720_v52 = vpop.f32.mrf.mxu1 }
 0x120   :  { %346 = vxpose.xlu0.b32.cont [7/16] (narrow) %v324_v47, 8 }
 0x122   :  { %v728_v57 = vpop.f32.mrf.mxu1 }
 0x128   :  { %347 = vxpose.xlu0.b32.cont [8/16] (narrow) %v325_v48, 8  ;;  %v245_v48 = vadd.f32 %v747_v5, %v728_v57 }
 0x12a   :  { %v733_v60 = vpop.f32.mrf.mxu1 }
 0x12b   :  { %v248_v45 = vadd.f32 %v747_v5, %v733_v60 }
 0x130   :  { %348 = vxpose.xlu0.b32.cont [9/16] (narrow) %v326_v49, 8  ;;  %v289_v49 = vmul.f32 0.2, %v248_v45 }
 0x132   :  { %v250_v63 = vpop.f32.mrf.mxu1 }
 0x133   :  { %v251_v43 = vadd.f32 %v747_v5, %v250_v63 }
 0x135   :  { %v290_v46 = vmul.f32 0.2, %v251_v43 }
 0x138   :  { %349 = vxpose.xlu0.b32.cont [10/16] (narrow) %v327_v51, 8  ;;  %v306_v51 = vmax.f32 %v251_v43, %v290_v46 }
 0x13a   :  { %v253_v3 = vpop.f32.mrf.mxu1 }
 0x13b   :  { %v254_v37 = vadd.f32 %v747_v5, %v253_v3 }
 0x13d   :  { %v291_v44 = vmul.f32 0.2, %v254_v37 }
 0x13f   :  { %v307_v47 = vmax.f32 %v254_v37, %v291_v44 }
 0x140   :  { %350 = vxpose.xlu0.b32.cont [11/16] (narrow) %v328_v54, 8  ;;  %v288_v54 = vmul.f32 0.2, %v245_v48 }
 0x142   :  { %v256_v9 = vpop.f32.mrf.mxu1 }
 0x143   :  { %v257_v34 = vadd.f32 %v747_v5, %v256_v9 }
 0x145   :  { %v292_v38 = vmul.f32 0.2, %v257_v34 }
 0x147   :  { %v308_v40 = vmax.f32 %v257_v34, %v292_v38 }
 0x148   :  { %351 = vxpose.xlu0.b32.cont [12/16] (narrow) %v329_v56, 8  ;;  %v239_v56 = vadd.f32 %v747_v5, %v715_v50 }
 0x14a   :  { %v259_v17 = vpop.f32.mrf.mxu1  ;;  %v286_v60 = vmul.f32 0.2, %v239_v56 }
 0x14b   :  { %v260_v31 = vadd.f32 %v747_v5, %v259_v17 }
 0x14d   :  { %v293_v35 = vmul.f32 0.2, %v260_v31 }
 0x14f   :  { %v309_v39 = vmax.f32 %v260_v31, %v293_v35 }
 0x150   :  { %352 = vxpose.xlu0.b32.cont [13/16] (narrow) %v330_v59, 8  ;;  %v304_v59 = vmax.f32 %v245_v48, %v288_v54 }
 0x152   :  { %v262_v27 = vpop.f32.mrf.mxu1 }
 0x153   :  { %v263_v28 = vadd.f32 %v747_v5, %v262_v27 }
 0x155   :  { %v294_v32 = vmul.f32 0.2, %v263_v28 }
 0x157   :  { %v310_v36 = vmax.f32 %v263_v28, %v294_v32 }
 0x158   :  { %353 = vxpose.xlu0.b32.cont [14/16] (narrow) %v331_v61, 8 }
 0x160   :  { %v265_v53 = vpop.f32.mrf.mxu3  ;;  %354 = vxpose.xlu0.b32.cont [15/16] (narrow) %v332_v0, 8 }
 0x161   :  { %v266_v24 = vadd.f32 %v747_v5, %v265_v53  ;;  %v242_v53 = vadd.f32 %v747_v5, %v720_v52 }
 0x163   :  { %v295_v29 = vmul.f32 0.2, %v266_v24 }
 0x165   :  { %v311_v33 = vmax.f32 %v266_v24, %v295_v29 }
 0x168   :  { %v268_v55 = vpop.f32.mrf.mxu3  ;;  %355 = vxpose.xlu0.b32.end [16/16] (narrow) %v333_v2, 8 }
 0x169   :  { %v269_v21 = vadd.f32 %v747_v5, %v268_v55  ;;  %v305_v55 = vmax.f32 %v248_v45, %v289_v49 }
 0x16b   :  { %v296_v25 = vmul.f32 0.2, %v269_v21 }
 0x16d   :  { %v312_v30 = vmax.f32 %v269_v21, %v296_v25 }
 0x170   :  { %v271_v58 = vpop.f32.mrf.mxu3 }
 0x171   :  { %v272_v18 = vadd.f32 %v747_v5, %v271_v58  ;;  %v287_v58 = vmul.f32 0.2, %v242_v53 }
 0x173   :  { %v297_v22 = vmul.f32 0.2, %v272_v18  ;;  %v303_v61 = vmax.f32 %v242_v53, %v287_v58 }
 0x175   :  { %v313_v26 = vmax.f32 %v272_v18, %v297_v22 }
 0x178   :  { %v274_v62 = vpop.f32.mrf.mxu3 }
 0x179   :  { %v275_v14 = vadd.f32 %v747_v5, %v274_v62  ;;  %v302_v62 = vmax.f32 %v239_v56, %v286_v60 }
 0x17b   :  { %v298_v19 = vmul.f32 0.2, %v275_v14 }
 0x17d   :  { %v314_v23 = vmax.f32 %v275_v14, %v298_v19 }
 0x180   :  { %v277_v1 = vpop.f32.mrf.mxu3  ;;  %v338_v63 = vpop.permute.xlu1 %337 }
 0x181   :  { %v278_v11 = vadd.f32 %v747_v5, %v277_v1 }
 0x183   :  { %v299_v15 = vmul.f32 0.2, %v278_v11 }
 0x185   :  { %v315_v20 = vmax.f32 %v278_v11, %v299_v15 }
 0x188   :  { %v280_v4 = vpop.f32.mrf.mxu3 }
 0x189   :  { %v281_v7 = vadd.f32 %v747_v5, %v280_v4 }
 0x18b   :  { %v300_v12 = vmul.f32 0.2, %v281_v7 }
 0x18d   :  { %v316_v16 = vmax.f32 %v281_v7, %v300_v12 }
 0x190   :  { %v283_v6 = vpop.f32.mrf.mxu3 }
 0x191   :  { %v284_v8 = vadd.f32 %v747_v5, %v283_v6 }
 0x193   :  { %v301_v10 = vmul.f32 0.2, %v284_v8 }
 0x194   :  { %v356_v57 = vpop.trf.xlu0 }
 0x195   :  { %v317_v13 = vmax.f32 %v284_v8, %v301_v10 }
 0x197   :  { %372 = vmatpush.xpose.msra.mxu2 %v317_v13 }
 0x19b   :  { %373 = vmatpush.xpose.msra.mxu2 %v316_v16 }
 0x19f   :  { %374 = vmatpush.xpose.msra.mxu2 %v315_v20 }
 0x1a3   :  { %375 = vmatpush.xpose.msra.mxu2 %v314_v23 }
 0x1a7   :  { %376 = vmatpush.xpose.msra.mxu2 %v313_v26 }
 0x1ab   :  { %377 = vmatpush.xpose.msra.mxu2 %v312_v30 }
 0x1af   :  { %378 = vmatpush.xpose.msra.mxu2 %v311_v33 }
 0x1b3   :  { %379 = vmatpush.xpose.msra.mxu2 %v310_v36 }
 0x1b7   :  { %380 = vmatpush.xpose.msra.mxu2 %v309_v39 }
 0x1bb   :  { %381 = vmatpush.xpose.msra.mxu2 %v308_v40 }
 0x1bf   :  { %382 = vmatpush.xpose.msra.mxu2 %v307_v47 }
 0x1c3   :  { %383 = vmatpush.xpose.msra.mxu2 %v306_v51 }
 0x1c7   :  { %384 = vmatpush.xpose.msra.mxu2 %v305_v55 }
 0x1cb   :  { %385 = vmatpush.xpose.msra.mxu2 %v304_v59 }
 0x1cf   :  { %386 = vmatpush.xpose.msra.mxu2 %v303_v61  ;;  %456 = vset.pattern.permute.xlu0 %v489_v42 }
 0x1d3   :  { %387 = vmatpush.xpose.msra.mxu2 %v302_v62 }
 0x1d6   :  { %388 = vmatmul.f32.vlgmr.msra.gmra.mxu2 %v356_v57 }
 0x259   :  { %v389_v0 = vpop.f32.mrf.mxu2 }
 0x25a   :  { %v390_v52 = vadd.f32 %v389_v0, %v338_v63 }
 0x25c   :  { %v392_v1 = vand.u32 2147483647, %v390_v52  ;;  %vm398_vm1 = vcmp.ge.f32.partialorder %v390_v52, 0.0 }
 0x25e   :  { %v393_v2 = vsub.f32 0.0, %v392_v1 }
 0x260   :  { %v394_v3 = vmul.f32 1.442695, %v393_v2 }
 0x262   :  { %459 = vpow2.f32 %v394_v3 }
 0x268   :  { %v460_v4 = vpop.eup %459 }
 0x269   :  { %v396_v50 = vadd.f32 1.0, %v460_v4 }
 0x26b   :  { %461 = vrcp.f32 %v396_v50 }
 0x271   :  { %v462_v5 = vpop.eup %461 }
 0x272   :  { %v399_v6 = vmul.f32 %v462_v5, %v460_v4 }
 0x274   :  { %v400_v7 = vsel %vm398_vm1, %v462_v5, %v399_v6 }
 0x275   :  { %401 = vst [vmem:[#allocation2] sm:$0xff] %v400_v7 }
 0x276   :  { %412 = dma.vmem_to_hbm [thread:$0]  %s408_s15, 128, %s410_s18, [#allocation3]  }
 0x277   :  { %487 = dma.done.wait [#allocation3], 128  }
 0x278   :  { %488 = vsyncadd [#allocation3], 4294967168 }
 0x279   :  { %417 = vsyncpa [#allocation3], 1 }

</bundles_post_ra>
